<compile_context>
chip_gen: v7x
topology: tpu7x:2x2x1
jax: 0.10.0
libtpu: 0.0.40
codegen_flags: <defaults>
</compile_context>

<pallas_src>
import math

import jax
import jax.numpy as jnp
from jax import lax
from jax.experimental import pallas as pl
from jax.experimental.pallas import tpu as pltpu


def meta_adapter_kernel(q_ref, k_ref, v_ref, wqk_ref, wk_ref, wa_ref, ba_ref, o_ref):
    """One batch tile of the MetaAdapter forward.

    q_ref  : (TB, C)      raw query tile (also the residual)
    k_ref  : (TB, K, C)   keys
    v_ref  : (TB, K, C)   values
    wqk_ref: (C, 2C)      [Wq^T | Wk^T] fused, VMEM resident
    wk_ref : (C, C)       Wk^T, VMEM resident
    wa_ref : (1, C)       alpha_proj weight (row vector), VMEM resident
    ba_ref : (1, 1)       alpha_proj bias, SMEM
    o_ref  : (TB, C)      output tile
    """
    TB, K, C = k_ref.shape

    q_in = q_ref[...]                       # native dtype: MXU operand
    q = q_in.astype(jnp.float32)            # f32 copy for residual / vector math

    # ---- fused query-side projection: one MXU call gives q_proj & k_proj(q) ----
    qf = jnp.dot(q_in, wqk_ref[...], preferred_element_type=jnp.float32)  # (TB, 2C)
    qp = qf[:, :C]                          # q_proj(query)
    kq = qf[:, C:]                          # k_proj(query)  (row 0 of the key seq)

    # ---- key projection: all K keys in a single MXU call ----------------------
    kk = jnp.dot(k_ref[...].reshape(TB * K, C), wk_ref[...],
                 preferred_element_type=jnp.float32).reshape(TB, K, C)

    scale = 1.0 / math.sqrt(C)              # C == self.dim
    # score against the query row of the concatenated sequence
    s0 = jnp.sum(qp * kq, axis=-1, keepdims=True) * scale                   # (TB, 1)
    # scores against the K keys, routed through the MXU (batched matmul)
    sk = jnp.einsum("bqc,bkc->bqk", qp[:, None, :], kk,
                    preferred_element_type=jnp.float32)[:, 0, :] * scale    # (TB, K)

    # ---- softmax over the (K+1)-long sequence (no concat materialized) --------
    m = jnp.maximum(s0, jnp.max(sk, axis=-1, keepdims=True))                # (TB, 1)
    e0 = jnp.exp(s0 - m)                                                    # (TB, 1)
    ek = jnp.exp(sk - m)                                                    # (TB, K)
    inv = pl.reciprocal(e0 + jnp.sum(ek, axis=-1, keepdims=True), approx=True)
    w0 = e0 * inv                                                           # (TB, 1)
    wv = ek * inv                                                           # (TB, K)

    # attn = softmax_weights @ [raw_query ; value]   (value part on the MXU)
    av = jnp.einsum("bqk,bkc->bqc", wv[:, None, :].astype(v_ref.dtype), v_ref[...],
                    preferred_element_type=jnp.float32)[:, 0, :]            # (TB, C)
    attn = w0 * q + av                                                      # (TB, C)

    # alpha = sigmoid(alpha_proj(residual))
    wa = wa_ref[...].astype(jnp.float32)                                    # (1, C)
    alpha = jax.nn.sigmoid(jnp.sum(q * wa, axis=-1, keepdims=True) + ba_ref[0, 0])

    out = q + alpha * attn                                                  # residual
    ss = jnp.sum(out * out, axis=-1, keepdims=True)
    # F.normalize(p=2, dim=-1):  out / max(||out||, 1e-12)  ==  out * rsqrt(max(ss,1e-24))
    out = out * lax.rsqrt(jnp.maximum(ss, 1e-24))

    o_ref[...] = out.astype(o_ref.dtype)


def prepare_weights(wq, wk):
    """Hoisted out of the per-call path: wq/wk are (out, in) torch layout.

    Returns (wqk_t, wk_t): [Wq^T | Wk^T] of shape (C, 2C) and Wk^T of shape (C, C).
    """
    wq = jnp.asarray(wq)
    wk = jnp.asarray(wk)
    return jnp.concatenate([wq.T, wk.T], axis=1), wk.T


def _round_up(x, m):
    return ((x + m - 1) // m) * m


def meta_adapter_forward(query, key, value, wqk_t, wk_t, wa, ba, *, tb=None):
    """query (B,C); key,value (B,K,C); wqk_t (C,2C); wk_t (C,C); wa (1,C); ba (1,)."""
    B, K, C = key.shape
    wa2d = jnp.asarray(wa).reshape(1, C)
    ba2d = jnp.asarray(ba, jnp.float32).reshape(1, 1)

    if tb is None:
        # Multiple of 8 (sublane constraint).  Capped at 64 so that double-buffered
        # (TB*C + 2*TB*K*C) tiles + resident weights stay well inside v7x's smaller
        # (64 MiB physical / 32 MiB scoped) VMEM even at dim=1024; v5e/v6e have slack.
        tb = max(8, min(64, _round_up(B, 8)))

    bp = _round_up(B, tb)
    if bp != B:  # pad batch so every tile is full; padded rows are dropped below
        query = jnp.pad(query, ((0, bp - B), (0, 0)))
        key = jnp.pad(key, ((0, bp - B), (0, 0), (0, 0)))
        value = jnp.pad(value, ((0, bp - B), (0, 0), (0, 0)))

    act_bytes = jnp.dtype(query.dtype).itemsize
    w_bytes = jnp.dtype(wk_t.dtype).itemsize
    cost = pl.CostEstimate(
        flops=2 * bp * (K + 2) * C * C + 8 * bp * K * C,
        transcendentals=bp * (K + 4),
        bytes_accessed=(2 * bp * C + 2 * bp * K * C) * act_bytes
        + (3 * C * C + C + 1) * w_bytes,
    )

    out = pl.pallas_call(
        meta_adapter_kernel,
        out_shape=jax.ShapeDtypeStruct((bp, C), query.dtype),
        grid=(bp // tb,),
        in_specs=[
            pl.BlockSpec((tb, C), lambda i: (i, 0)),          # query tile
            pl.BlockSpec((tb, K, C), lambda i: (i, 0, 0)),    # key tile
            pl.BlockSpec((tb, K, C), lambda i: (i, 0, 0)),    # value tile
            pl.BlockSpec((C, 2 * C), lambda i: (0, 0)),       # fused [Wq^T|Wk^T], resident
            pl.BlockSpec((C, C), lambda i: (0, 0)),           # Wk^T, resident
            pl.BlockSpec((1, C), lambda i: (0, 0)),           # alpha weight, resident
            pl.BlockSpec(memory_space=pltpu.MemorySpace.SMEM),  # alpha bias scalar
        ],
        out_specs=pl.BlockSpec((tb, C), lambda i: (i, 0)),
        compiler_params=pltpu.CompilerParams(
            dimension_semantics=("parallel",),                 # v7x: split tiles across 2 TCs
        ),
        cost_estimate=cost,
    )(query, key, value, wqk_t, wk_t, wa2d, ba2d)
    return out[:B]


def ref_forward(query, key, value, wq, wk, wa, ba):
    """Pure-JAX reference mirroring the PyTorch forward exactly."""
    B, K, C = key.shape
    res = query
    q3 = query[:, None, :]                                    # (B,1,C)
    kcat = jnp.concatenate([q3, key], axis=1)                 # (B,K+1,C)
    vcat = jnp.concatenate([q3, value], axis=1)               # (B,K+1,C)
    qp = q3 @ wq.T                                            # (B,1,C)
    kp = kcat @ wk.T                                          # (B,K+1,C)
    scores = (qp @ jnp.swapaxes(kp, -1, -2)) / jnp.sqrt(jnp.float32(C))
    w = jax.nn.softmax(scores, axis=-1)                       # (B,1,K+1)
    attn = (w @ vcat)[:, 0, :]                                # (B,C)
    alpha = jax.nn.sigmoid(res @ wa.T + ba)                   # (B,1)
    out = res + alpha * attn
    nrm = jnp.linalg.norm(out, axis=-1, keepdims=True)
    return out / jnp.maximum(nrm, 1e-12)


if __name__ == "__main__":
    B, K, C = 2, 8, 128   # small shapes; C == self.dim, num_heads == 1

    key0 = jax.random.PRNGKey(0)
    k_q, k_k, k_v, k_wq, k_wk, k_wa = jax.random.split(key0, 6)

    query = jax.random.normal(k_q, (B, C), jnp.float32)
    key_in = jax.random.normal(k_k, (B, K, C), jnp.float32)
    value_in = jax.random.normal(k_v, (B, K, C), jnp.float32)

    # Deterministic xavier_uniform-style init (same distributions as torch init).
    bqk = math.sqrt(6.0 / (C + C))
    wq = jax.random.uniform(k_wq, (C, C), jnp.float32, -bqk, bqk)   # (out, in)
    wk = jax.random.uniform(k_wk, (C, C), jnp.float32, -bqk, bqk)
    ba_bound = math.sqrt(6.0 / (C + 1))
    wa = jax.random.uniform(k_wa, (1, C), jnp.float32, -ba_bound, ba_bound)
    ba = jnp.ones((1,), jnp.float32)                                # constant_(bias, 1)

    # Weight prep (transpose + fuse) is hoisted out of the per-call path.
    wqk_t, wk_t = prepare_weights(wq, wk)

    out = meta_adapter_forward(query, key_in, value_in, wqk_t, wk_t, wa, ba)
    out = jax.block_until_ready(out)

    ref = ref_forward(query, key_in, value_in, wq, wk, wa, ba)
    assert out.shape == (B, C)
    # Tolerance covers the EUP approximate reciprocal used for the softmax
    # denominator (~1e-3 relative at worst, damped by residual + L2-normalize).
    assert jnp.allclose(out, ref, rtol=5e-3, atol=5e-3), "mismatch vs. reference"

    print("KERNEL_OK")
</pallas_src>

<mosaic_0001>
module attributes {stable_mosaic.version = 11 : i64} {
  func.func @meta_adapter_kernel(%arg0: i32, %arg1: memref<8x128xf32, #tpu.memory_space<vmem>>, %arg2: memref<8x8x128xf32, #tpu.memory_space<vmem>>, %arg3: memref<8x8x128xf32, #tpu.memory_space<vmem>>, %arg4: memref<128x256xf32, #tpu.memory_space<vmem>>, %arg5: memref<128x128xf32, #tpu.memory_space<vmem>>, %arg6: memref<1x128xf32, #tpu.memory_space<vmem>>, %arg7: memref<1x1xf32, #tpu.memory_space<smem>>, %arg8: memref<8x128xf32, #tpu.memory_space<vmem>>) attributes {dimension_semantics = [#tpu.dimension_semantics<parallel>], iteration_bounds = array<i64: 1>, scalar_prefetch = 0 : i64, scratch_operands = 0 : i64, tpu.core_type = #tpu.core_type<tc>, window_params = [{transform_indices = @transform_0, window_bounds = array<i64: 8, 128>}, {transform_indices = @transform_1, window_bounds = array<i64: 8, 8, 128>}, {transform_indices = @transform_2, window_bounds = array<i64: 8, 8, 128>}, {pipeline_mode = #tpu.pipeline_mode<synchronous>, transform_indices = @transform_3, window_bounds = array<i64: 128, 256>}, {pipeline_mode = #tpu.pipeline_mode<synchronous>, transform_indices = @transform_4, window_bounds = array<i64: 128, 128>}, {pipeline_mode = #tpu.pipeline_mode<synchronous>, transform_indices = @transform_5, window_bounds = array<i64: 1, 128>}, {transform_indices = @transform_6, window_bounds = array<i64: 1, 1>}, {transform_indices = @transform_7, window_bounds = array<i64: 8, 128>}]} {
    %c0 = arith.constant 0 : index
    %c0_0 = arith.constant 0 : index
    %0 = vector.load %arg1[%c0, %c0_0] : memref<8x128xf32, #tpu.memory_space<vmem>>, vector<8x128xf32>
    %c0_1 = arith.constant 0 : index
    %c0_2 = arith.constant 0 : index
    %1 = vector.load %arg4[%c0_1, %c0_2] : memref<128x256xf32, #tpu.memory_space<vmem>>, vector<128x256xf32>
    %cst = arith.constant dense<0.000000e+00> : vector<8x256xf32>
    %2 = tpu.matmul %0, %1, %cst {dimension_numbers = #tpu.dot_dimension_numbers<[1], [0], [0], [1], [0, 0, 1, 1], [], []>} : vector<8x128xf32>, vector<128x256xf32>, vector<8x256xf32> -> vector<8x256xf32>
    %3 = vector.extract_strided_slice %2 {offsets = [0, 0], sizes = [8, 128], strides = [1, 1]} : vector<8x256xf32> to vector<8x128xf32>
    %4 = vector.extract_strided_slice %2 {offsets = [0, 128], sizes = [8, 128], strides = [1, 1]} : vector<8x256xf32> to vector<8x128xf32>
    %c0_3 = arith.constant 0 : index
    %c0_4 = arith.constant 0 : index
    %c0_5 = arith.constant 0 : index
    %5 = vector.load %arg2[%c0_3, %c0_4, %c0_5] : memref<8x8x128xf32, #tpu.memory_space<vmem>>, vector<8x8x128xf32>
    %6 = vector.shape_cast %5 : vector<8x8x128xf32> to vector<64x128xf32>
    %c0_6 = arith.constant 0 : index
    %c0_7 = arith.constant 0 : index
    %7 = vector.load %arg5[%c0_6, %c0_7] : memref<128x128xf32, #tpu.memory_space<vmem>>, vector<128x128xf32>
    %cst_8 = arith.constant dense<0.000000e+00> : vector<64x128xf32>
    %8 = tpu.matmul %6, %7, %cst_8 {dimension_numbers = #tpu.dot_dimension_numbers<[1], [0], [0], [1], [0, 0, 1, 1], [], []>} : vector<64x128xf32>, vector<128x128xf32>, vector<64x128xf32> -> vector<64x128xf32>
    %9 = vector.shape_cast %8 : vector<64x128xf32> to vector<8x8x128xf32>
    %10 = arith.mulf %3, %4 : vector<8x128xf32>
    %cst_9 = arith.constant dense<0.000000e+00> : vector<8xf32>
    %11 = vector.multi_reduction <add>, %10, %cst_9 [1] : vector<8x128xf32> to vector<8xf32>
    %12 = vector.shape_cast %11 : vector<8xf32> to vector<8x1xf32>
    %cst_10 = arith.constant 0.0883883461 : f32
    %13 = vector.broadcast %cst_10 : f32 to vector<8x1xf32>
    %14 = arith.mulf %12, %13 : vector<8x1xf32>
    %15 = vector.shape_cast %3 : vector<8x128xf32> to vector<8x1x128xf32>
    "tpu.trace_start"() <{level = 10 : i32, message = "bqc,bkc->bqk"}> : () -> ()
    %cst_11 = arith.constant dense<0.000000e+00> : vector<8x1x8xf32>
    %16 = tpu.matmul %15, %9, %cst_11 {dimension_numbers = #tpu.dot_dimension_numbers<[2], [2], [1], [1], [0, 0, 0, 1, 1, 1], [0], [0]>} : vector<8x1x128xf32>, vector<8x8x128xf32>, vector<8x1x8xf32> -> vector<8x1x8xf32>
    "tpu.trace_stop"() : () -> ()
    %17 = vector.shape_cast %16 : vector<8x1x8xf32> to vector<8x8xf32>
    %cst_12 = arith.constant 0.0883883461 : f32
    %18 = vector.broadcast %cst_12 : f32 to vector<8x8xf32>
    %19 = arith.mulf %17, %18 : vector<8x8xf32>
    %cst_13 = arith.constant dense<0xFF800000> : vector<8xf32>
    %20 = vector.multi_reduction <maximumf>, %19, %cst_13 [1] : vector<8x8xf32> to vector<8xf32>
    %21 = vector.shape_cast %20 : vector<8xf32> to vector<8x1xf32>
    %22 = arith.maximumf %14, %21 : vector<8x1xf32>
    %23 = arith.subf %14, %22 : vector<8x1xf32>
    %24 = math.exp %23 : vector<8x1xf32>
    %25 = vector.broadcast %22 : vector<8x1xf32> to vector<8x8xf32>
    %26 = arith.subf %19, %25 : vector<8x8xf32>
    %27 = math.exp %26 : vector<8x8xf32>
    %cst_14 = arith.constant dense<0.000000e+00> : vector<8xf32>
    %28 = vector.multi_reduction <add>, %27, %cst_14 [1] : vector<8x8xf32> to vector<8xf32>
    %29 = vector.shape_cast %28 : vector<8xf32> to vector<8x1xf32>
    %30 = arith.addf %24, %29 : vector<8x1xf32>
    %31 = tpu.reciprocal %30 {approx = true} : vector<8x1xf32> -> vector<8x1xf32>
    %32 = arith.mulf %24, %31 : vector<8x1xf32>
    %33 = vector.broadcast %31 : vector<8x1xf32> to vector<8x8xf32>
    %34 = arith.mulf %27, %33 : vector<8x8xf32>
    %35 = vector.shape_cast %34 : vector<8x8xf32> to vector<8x1x8xf32>
    %c0_15 = arith.constant 0 : index
    %c0_16 = arith.constant 0 : index
    %c0_17 = arith.constant 0 : index
    %36 = vector.load %arg3[%c0_15, %c0_16, %c0_17] : memref<8x8x128xf32, #tpu.memory_space<vmem>>, vector<8x8x128xf32>
    "tpu.trace_start"() <{level = 10 : i32, message = "bqk,bkc->bqc"}> : () -> ()
    %cst_18 = arith.constant dense<0.000000e+00> : vector<8x1x128xf32>
    %37 = tpu.matmul %35, %36, %cst_18 {dimension_numbers = #tpu.dot_dimension_numbers<[2], [1], [1], [2], [0, 0, 0, 1, 1, 2], [0], [0]>} : vector<8x1x8xf32>, vector<8x8x128xf32>, vector<8x1x128xf32> -> vector<8x1x128xf32>
    "tpu.trace_stop"() : () -> ()
    %38 = vector.shape_cast %37 : vector<8x1x128xf32> to vector<8x128xf32>
    %39 = vector.broadcast %32 : vector<8x1xf32> to vector<8x128xf32>
    %40 = arith.mulf %39, %0 : vector<8x128xf32>
    %41 = arith.addf %40, %38 : vector<8x128xf32>
    %c0_19 = arith.constant 0 : index
    %c0_20 = arith.constant 0 : index
    %42 = vector.load %arg6[%c0_19, %c0_20] : memref<1x128xf32, #tpu.memory_space<vmem>>, vector<1x128xf32>
    %43 = vector.broadcast %42 : vector<1x128xf32> to vector<8x128xf32>
    %44 = arith.mulf %0, %43 : vector<8x128xf32>
    %cst_21 = arith.constant dense<0.000000e+00> : vector<8xf32>
    %45 = vector.multi_reduction <add>, %44, %cst_21 [1] : vector<8x128xf32> to vector<8xf32>
    %46 = vector.shape_cast %45 : vector<8xf32> to vector<8x1xf32>
    %c0_22 = arith.constant 0 : index
    %c0_23 = arith.constant 0 : index
    %47 = memref.load %arg7[%c0_22, %c0_23] : memref<1x1xf32, #tpu.memory_space<smem>>
    %48 = vector.broadcast %47 : f32 to vector<8x1xf32>
    %49 = arith.addf %46, %48 : vector<8x1xf32>
    %50 = arith.negf %49 : vector<8x1xf32>
    %51 = math.exp %50 : vector<8x1xf32>
    %cst_24 = arith.constant 1.000000e+00 : f32
    %52 = vector.broadcast %cst_24 : f32 to vector<8x1xf32>
    %53 = arith.addf %52, %51 : vector<8x1xf32>
    %54 = arith.divf %52, %53 : vector<8x1xf32>
    %55 = vector.broadcast %54 : vector<8x1xf32> to vector<8x128xf32>
    %56 = arith.mulf %55, %41 : vector<8x128xf32>
    %57 = arith.addf %0, %56 : vector<8x128xf32>
    %58 = arith.mulf %57, %57 : vector<8x128xf32>
    %cst_25 = arith.constant dense<0.000000e+00> : vector<8xf32>
    %59 = vector.multi_reduction <add>, %58, %cst_25 [1] : vector<8x128xf32> to vector<8xf32>
    %60 = vector.shape_cast %59 : vector<8xf32> to vector<8x1xf32>
    %cst_26 = arith.constant 1.000000e-24 : f32
    %61 = vector.broadcast %cst_26 : f32 to vector<8x1xf32>
    %62 = arith.maximumf %60, %61 : vector<8x1xf32>
    %63 = math.rsqrt %62 : vector<8x1xf32>
    %64 = vector.broadcast %63 : vector<8x1xf32> to vector<8x128xf32>
    %65 = arith.mulf %57, %64 : vector<8x128xf32>
    %c0_27 = arith.constant 0 : index
    %c0_28 = arith.constant 0 : index
    %66 = vector.load %arg8[%c0_27, %c0_28] : memref<8x128xf32, #tpu.memory_space<vmem>>, vector<8x128xf32>
    tpu.vector_store %arg8[%c0_27, %c0_28], %65 {strides = array<i32>} : memref<8x128xf32, #tpu.memory_space<vmem>>, vector<8x128xf32>,
    return
  }
  func.func @transform_0(%arg0: i32) -> (i32, i32) {
    %c0_i32 = arith.constant 0 : i32
    %c0_i32_0 = arith.constant 0 : i32
    return %arg0, %c0_i32 : i32, i32
  }
  func.func @transform_1(%arg0: i32) -> (i32, i32, i32) {
    %c0_i32 = arith.constant 0 : i32
    %c0_i32_0 = arith.constant 0 : i32
    %c0_i32_1 = arith.constant 0 : i32
    return %arg0, %c0_i32, %c0_i32_0 : i32, i32, i32
  }
  func.func @transform_2(%arg0: i32) -> (i32, i32, i32) {
    %c0_i32 = arith.constant 0 : i32
    %c0_i32_0 = arith.constant 0 : i32
    %c0_i32_1 = arith.constant 0 : i32
    return %arg0, %c0_i32, %c0_i32_0 : i32, i32, i32
  }
  func.func @transform_3(%arg0: i32) -> (i32, i32) {
    %c0_i32 = arith.constant 0 : i32
    %c0_i32_0 = arith.constant 0 : i32
    %c0_i32_1 = arith.constant 0 : i32
    return %c0_i32, %c0_i32_0 : i32, i32
  }
  func.func @transform_4(%arg0: i32) -> (i32, i32) {
    %c0_i32 = arith.constant 0 : i32
    %c0_i32_0 = arith.constant 0 : i32
    %c0_i32_1 = arith.constant 0 : i32
    return %c0_i32, %c0_i32_0 : i32, i32
  }
  func.func @transform_5(%arg0: i32) -> (i32, i32) {
    %c0_i32 = arith.constant 0 : i32
    %c0_i32_0 = arith.constant 0 : i32
    %c0_i32_1 = arith.constant 0 : i32
    return %c0_i32, %c0_i32_0 : i32, i32
  }
  func.func @transform_6(%arg0: i32) -> (i32, i32) {
    %c0_i32 = arith.constant 0 : i32
    %c0_i32_0 = arith.constant 0 : i32
    %c0_i32_1 = arith.constant 0 : i32
    return %c0_i32, %c0_i32_0 : i32, i32
  }
  func.func @transform_7(%arg0: i32) -> (i32, i32) {
    %c0_i32 = arith.constant 0 : i32
    %c0_i32_0 = arith.constant 0 : i32
    return %arg0, %c0_i32 : i32, i32
  }
}

</mosaic_0001>

<bundles_post_ra>
// kernel: tpu_custom_call.1
= control target key start
LH: loop header
LB: loop body
LE: loop exit
PB: predicated region body
PF: predicated region fallthrough
CT: control target
= control target key end

     0   :  { %13 = vsyncpa [#allocation4], 0  ;;  %s2446_s0 = inlined_call_operand.hbm [shape: f32[8,128], index: 0, kind: input, shape index: {}]   ;;  %s2447_s1 = inlined_call_operand.hbm [shape: f32[8,8,128], index: 1, kind: input, shape index: {}]   ;;  %s2448_s2 = inlined_call_operand.hbm [shape: f32[8,8,128], index: 2, kind: input, shape index: {}]   ;;  %s2449_s3 = inlined_call_operand.hbm [shape: f32[128,256], index: 3, kind: input, shape index: {}]   ;;  %s2450_s4 = inlined_call_operand.hbm [shape: f32[128,128], index: 4, kind: input, shape index: {}]   ;;  %s2451_s5 = inlined_call_operand.vmem [shape: f32[1,128], index: 5, kind: input, shape index: {}]   ;;  %s2452_s6 = inlined_call_operand.<no memory space> [shape: f32[1,1], index: 6, kind: input, shape index: {}]   ;;  %s2453_s7 = inlined_call_operand.hbm [shape: f32[8,128], index: 7, kind: output, shape index: {}]  }
   0x1   :  { %14 = vsyncpa [#allocation7], 0 }
   0x2   :  { %15 = vsyncpa [#allocation10], 0 }
   0x3   :  { %16 = vsyncpa [#allocation5], 0  ;;  %s2183_s24 = smov [#allocation6]   ;;  %s2043_s28 = scalar_lea.hbm %s2447_s1, 1024 }
   0x4   :  { %s32_s25 = sshll.u32 %s2183_s24, 4  ;;  %p2044_p0 = scmp.ne.s32.totalorder %s2447_s1, %s2043_s28  ;;  %s33_s25 = int_to_ptr.vmem [resolvable:$true] %s32_s25 }
   0x5   :  { %p2047_p1 = scmp.lt.u32.totalorder %s2043_s28, %s2447_s1 }
   0x7   :  { %p2049_p2 = pnand %p2047_p1, %p2044_p0 }
   0x9   :  { %2052 = shalt.err (!%p2049_p2)
}
   0xa   :  { %s2053_s10 = scalar_lea.vmem %s33_s25, 1024  ;;  %p2058_p4 = scmp.lt.s32.totalorder %s33_s25, %s33_s25 }
   0xb   :  { %p2054_p3 = scmp.ne.s32.totalorder %s33_s25, %s2053_s10  ;;  %p2059_p5 = scmp.lt.s32.totalorder %s2053_s10, %s2053_s10 }
   0xd   :  { %p2060_p6 = por %p2059_p5, %p2058_p4 }
   0xf   :  { %p2061_p7 = pnand %p2060_p6, %p2054_p3 }
  0x11   :  { %2064 = shalt.err (!%p2061_p7)
}
  0x12   :  { %s2184_s11 = smov 128   ;;  %s2185_s12 = smov 8  }
  0x13   :  { %38 = dma.hbm_to_vmem [thread:$0]  %s2447_s1, 1024, %s33_s25, [#allocation7], %s2184_s11, %s2184_s11, %s2185_s12  }
  0x14   :  { %s2186_s15 = smov [#allocation9]   ;;  %s2065_s19 = scalar_lea.hbm %s2449_s3, 4096 }
  0x15   :  { %s56_s16 = sshll.u32 %s2186_s15, 4  ;;  %p2066_p8 = scmp.ne.s32.totalorder %s2449_s3, %s2065_s19  ;;  %s57_s16 = int_to_ptr.vmem [resolvable:$true] %s56_s16 }
  0x16   :  { %p2069_p9 = scmp.lt.u32.totalorder %s2065_s19, %s2449_s3 }
  0x18   :  { %p2071_p10 = pnand %p2069_p9, %p2066_p8 }
  0x1a   :  { %2074 = shalt.err (!%p2071_p10)
}
  0x1b   :  { %s2075_s24 = scalar_lea.vmem %s57_s16, 4096  ;;  %p2080_p12 = scmp.lt.s32.totalorder %s57_s16, %s57_s16 }
  0x1c   :  { %p2076_p11 = scmp.ne.s32.totalorder %s57_s16, %s2075_s24  ;;  %p2081_p13 = scmp.lt.s32.totalorder %s2075_s24, %s2075_s24 }
  0x1e   :  { %p2082_p0 = por %p2081_p13, %p2080_p12 }
  0x20   :  { %p2083_p1 = pnand %p2082_p0, %p2076_p11 }
  0x22   :  { %2086 = shalt.err (!%p2083_p1)
}
  0x23   :  { %s2187_s1 = smov 256   ;;  %s2188_s25 = smov 16  }
  0x24   :  { %62 = dma.hbm_to_vmem [thread:$0]  %s2449_s3, 4096, %s57_s16, [#allocation10], %s2187_s1, %s2187_s1, %s2188_s25  }
  0x25   :  { %s2189_s28 = smov [#allocation3]   ;;  %s2190_s30 = smov [#allocation8]  }
  0x26   :  { %s23_s29 = sshll.u32 %s2189_s28, 4  ;;  %s44_s8 = sshll.u32 %s2190_s30, 4  ;;  %s24_s29 = int_to_ptr.vmem [resolvable:$true] %s23_s29  ;;  %s2263_s8 = int_to_ptr.vmem [resolvable:$true] %s44_s8 }
  0x27   :  { %s2087_s13 = scalar_lea.hbm %s2446_s0, 128 }
  0x28   :  { %p2088_p2 = scmp.ne.s32.totalorder %s2446_s0, %s2087_s13  ;;  %p2091_p3 = scmp.lt.u32.totalorder %s2087_s13, %s2446_s0 }
  0x2a   :  { %p2093_p4 = pnand %p2091_p3, %p2088_p2 }
  0x2c   :  { %2096 = shalt.err (!%p2093_p4)
}
  0x2d   :  { %s2097_s3 = scalar_lea.vmem %s24_s29, 128  ;;  %p2102_p6 = scmp.lt.s32.totalorder %s24_s29, %s24_s29 }
  0x2e   :  { %p2098_p5 = scmp.ne.s32.totalorder %s24_s29, %s2097_s3  ;;  %p2103_p7 = scmp.lt.s32.totalorder %s2097_s3, %s2097_s3 }
  0x30   :  { %p2104_p8 = por %p2103_p7, %p2102_p6 }
  0x32   :  { %p2105_p9 = pnand %p2104_p8, %p2098_p5 }
  0x34   :  { %2108 = shalt.err (!%p2105_p9)
}
  0x35   :  { %26 = dma.hbm_to_vmem [thread:$0]  %s2446_s0, 128, %s24_s29, [#allocation4]  }
  0x36   :  { %s2109_s22 = scalar_lea.hbm %s2448_s2, 1024 }
  0x37   :  { %p2110_p10 = scmp.ne.s32.totalorder %s2448_s2, %s2109_s22  ;;  %p2113_p11 = scmp.lt.u32.totalorder %s2109_s22, %s2448_s2 }
  0x39   :  { %p2115_p12 = pnand %p2113_p11, %p2110_p10 }
  0x3b   :  { %2118 = shalt.err (!%p2115_p12)
}
  0x3c   :  { %s2119_s26 = scalar_lea.vmem %s2263_s8, 1024  ;;  %p2124_p0 = scmp.lt.s32.totalorder %s2263_s8, %s2263_s8 }
  0x3d   :  { %p2120_p13 = scmp.ne.s32.totalorder %s2263_s8, %s2119_s26  ;;  %p2125_p1 = scmp.lt.s32.totalorder %s2119_s26, %s2119_s26 }
  0x3f   :  { %p2126_p2 = por %p2125_p1, %p2124_p0 }
  0x41   :  { %p2127_p3 = pnand %p2126_p2, %p2120_p13 }
  0x43   :  { %2130 = shalt.err (!%p2127_p3)
}
  0x44   :  { %50 = dma.hbm_to_vmem [thread:$0]  %s2448_s2, 1024, %s2263_s8, [#allocation7], %s2184_s11, %s2184_s11, %s2185_s12  }
  0x45   :  { %s2191_s28 = smov [#allocation11]   ;;  %s2131_s10 = scalar_lea.hbm %s2450_s4, 2048 }
  0x46   :  { %s68_s29 = sshll.u32 %s2191_s28, 4  ;;  %p2132_p4 = scmp.ne.s32.totalorder %s2450_s4, %s2131_s10  ;;  %s69_s29 = int_to_ptr.vmem [resolvable:$true] %s68_s29 }
  0x47   :  { %p2135_p5 = scmp.lt.u32.totalorder %s2131_s10, %s2450_s4 }
  0x49   :  { %p2137_p6 = pnand %p2135_p5, %p2132_p4 }
  0x4b   :  { %2140 = shalt.err (!%p2137_p6)
}
  0x4c   :  { %s2141_s18 = scalar_lea.vmem %s69_s29, 2048  ;;  %p2146_p8 = scmp.lt.s32.totalorder %s69_s29, %s69_s29 }
  0x4d   :  { %p2142_p7 = scmp.ne.s32.totalorder %s69_s29, %s2141_s18  ;;  %p2147_p9 = scmp.lt.s32.totalorder %s2141_s18, %s2141_s18 }
  0x4f   :  { %p2148_p10 = por %p2147_p9, %p2146_p8 }
  0x51   :  { %p2149_p11 = pnand %p2148_p10, %p2142_p7 }
  0x53   :  { %2152 = shalt.err (!%p2149_p11)
}
  0x54   :  { %74 = dma.hbm_to_vmem [thread:$0]  %s2450_s4, 2048, %s69_s29, [#allocation10], %s2184_s11, %s2184_s11, %s2185_s12  }
  0x55   :  { %2175 = dma.done.wait [#allocation4], 128  }
  0x56   :  { %2176 = vsyncadd [#allocation4], 4294967168 }
  0x57   :  { %2177 = dma.done.wait [#allocation7], 2048  }
  0x58   :  { %2178 = vsyncadd [#allocation7], 4294965248 }
  0x59   :  { %2179 = dma.done.wait [#allocation10], 6144  }
  0x5a   :  { %2180 = vsyncadd [#allocation10], 4294961152  ;;  %v2192_v0 = vmov 0.0   ;;  %v96_v1 = vld [vmem:[#allocation9 + $0x8] sm:$0xff]  ;;  %v98_v2 = vld [vmem:[#allocation9 + $0x18] sm:$0xff]  ;;  %vm2193_vm0 = vmmov 0  }
  0x5b   :  { %191 = vmatprep.mubr.f32.mxu0 %v2192_v0  ;;  %v206_v3 = vld [vmem:[#allocation11] sm:$0xff]  ;;  %v1940_v4 = vpack.c.bf16 %v98_v2, %v96_v1  ;;  %v207_v5 = vld [vmem:[#allocation11 + $0x8] sm:$0xff]  ;;  %v97_v7 = vld [vmem:[#allocation9 + $0x10] sm:$0xff]  ;;  %vm966_vm1 = vcmask 1041409   ;;  %vm969_vm2 = vcmask 1042434   ;;  %vm972_vm3 = vcmask 1043459  }
  0x5c   :  { %v95_v6 = vld [vmem:[#allocation9] sm:$0xff]  ;;  %v1972_v8 = vpack.c.bf16 %v207_v5, %v206_v3  ;;  %v100_v10 = vld [vmem:[#allocation9 + $0x28] sm:$0xff]  ;;  %v102_v11 = vld [vmem:[#allocation9 + $0x38] sm:$0xff]  ;;  %vm975_vm4 = vcmask 1044484   ;;  %vm978_vm5 = vcmask 1045509   ;;  %vm981_vm6 = vcmask 1046534  }
  0x5d   :  { %v1942_v9 = vpack.c.bf16 %v97_v7, %v95_v6  ;;  %v208_v12 = vld [vmem:[#allocation11 + $0x10] sm:$0xff]  ;;  %1941 = vmatprep.subr.bf16.mxu0 %v1940_v4  ;;  %v1944_v13 = vpack.c.bf16 %v102_v11, %v100_v10  ;;  %v209_v14 = vld [vmem:[#allocation11 + $0x18] sm:$0xff]  ;;  %v99_v15 = vld [vmem:[#allocation9 + $0x20] sm:$0xff]  ;;  %vm984_vm7 = vcmask 1047559   ;;  %vm987_vm8 = vcmask 64512  }
  0x5e   :  { %v101_v16 = vld [vmem:[#allocation9 + $0x30] sm:$0xff]  ;;  %1973 = vmatprep.subr.bf16.mxu1 %v1972_v8  ;;  %v1976_v17 = vpack.c.bf16 %v209_v14, %v208_v12  ;;  %v104_v19 = vld [vmem:[#allocation9 + $0x48] sm:$0xff]  ;;  %v106_v20 = vld [vmem:[#allocation9 + $0x58] sm:$0xff] }
  0x5f   :  { %1943 = vmatpush1.bf16.msra.mxu0 %v1942_v9  ;;  %v1946_v18 = vpack.c.bf16 %v101_v16, %v99_v15  ;;  %v210_v21 = vld [vmem:[#allocation11 + $0x20] sm:$0xff]  ;;  %1975 = vmatpush3.bf16.msra.mxu1 %v1972_v8  ;;  %v1948_v22 = vpack.c.bf16 %v106_v20, %v104_v19  ;;  %v211_v23 = vld [vmem:[#allocation11 + $0x28] sm:$0xff]  ;;  %v105_v25 = vld [vmem:[#allocation9 + $0x50] sm:$0xff]  ;;  %v2194_v19 = vmov 1966171168  }
  0x60   :  { %1945 = vmatprep.subr.bf16.mxu0 %v1944_v13  ;;  %v103_v24 = vld [vmem:[#allocation9 + $0x40] sm:$0xff]  ;;  %1977 = vmatprep.subr.bf16.mxu1 %v1976_v17  ;;  %v1980_v26 = vpack.c.bf16 %v211_v23, %v210_v21  ;;  %v108_v27 = vld [vmem:[#allocation9 + $0x68] sm:$0xff]  ;;  %v110_v28 = vld [vmem:[#allocation9 + $0x78] sm:$0xff]  ;;  %v334_v20 = vunpack.c.l.s4 %v2194_v19  ;;  %v336_v21 = vlaneseq }
  0x61   :  { %v212_v29 = vld [vmem:[#allocation11 + $0x30] sm:$0xff]  ;;  %v213_v30 = vld [vmem:[#allocation11 + $0x38] sm:$0xff]  ;;  %v1950_v31 = vpack.c.bf16 %v105_v25, %v103_v24  ;;  %v1952_v32 = vpack.c.bf16 %v110_v28, %v108_v27  ;;  %v107_v33 = vld [vmem:[#allocation9 + $0x60] sm:$0xff] }
  0x62   :  { %v109_v34 = vld [vmem:[#allocation9 + $0x70] sm:$0xff]  ;;  %v1984_v35 = vpack.c.bf16 %v213_v30, %v212_v29  ;;  %v112_v36 = vld [vmem:[#allocation9 + $0x88] sm:$0xff]  ;;  %v114_v37 = vld [vmem:[#allocation9 + $0x98] sm:$0xff]  ;;  %v337_v23 = vshrl.u32 %v336_v21, 7 }
  0x63   :  { %1947 = vmatpush1.bf16.msra.mxu0 %v1946_v18  ;;  %1979 = vmatpush3.bf16.msra.mxu1 %v1976_v17  ;;  %v214_v38 = vld [vmem:[#allocation11 + $0x40] sm:$0xff]  ;;  %v215_v39 = vld [vmem:[#allocation11 + $0x48] sm:$0xff]  ;;  %v1954_v40 = vpack.c.bf16 %v109_v34, %v107_v33  ;;  %v1956_v41 = vpack.c.bf16 %v114_v37, %v112_v36  ;;  %v113_v43 = vld [vmem:[#allocation9 + $0x90] sm:$0xff] }
  0x64   :  { %1949 = vmatprep.subr.bf16.mxu0 %v1948_v22  ;;  %1981 = vmatprep.subr.bf16.mxu1 %v1980_v26  ;;  %v111_v42 = vld [vmem:[#allocation9 + $0x80] sm:$0xff]  ;;  %v1988_v44 = vpack.c.bf16 %v215_v39, %v214_v38  ;;  %v116_v45 = vld [vmem:[#allocation9 + $0xa8] sm:$0xff]  ;;  %v118_v46 = vld [vmem:[#allocation9 + $0xb8] sm:$0xff]  ;;  %v335_v22 = vunpack.c.0.s8 %v334_v20 }
  0x65   :  { %v216_v47 = vld [vmem:[#allocation11 + $0x50] sm:$0xff]  ;;  %v217_v48 = vld [vmem:[#allocation11 + $0x58] sm:$0xff]  ;;  %v1958_v49 = vpack.c.bf16 %v113_v43, %v111_v42  ;;  %v198_v50 = vld [vmem:[#allocation6] sm:$0xff]  ;;  %v1960_v51 = vpack.c.bf16 %v118_v46, %v116_v45 }
  0x66   :  { %v115_v52 = vld [vmem:[#allocation9 + $0xa0] sm:$0xff]  ;;  %v117_v53 = vld [vmem:[#allocation9 + $0xb0] sm:$0xff]  ;;  %v1992_v54 = vpack.c.bf16 %v217_v48, %v216_v47  ;;  %v120_v55 = vld [vmem:[#allocation9 + $0xc8] sm:$0xff]  ;;  %1848 = vmatprep.mubr.f32.mxu1 %v198_v50  ;;  %v338_v24 = vsub.s32 %v335_v22, %v337_v23 }
  0x67   :  { %1951 = vmatpush1.bf16.msra.mxu0 %v1950_v31  ;;  %1983 = vmatpush3.bf16.msra.mxu1 %v1980_v26  ;;  %v122_v56 = vld [vmem:[#allocation9 + $0xd8] sm:$0xff]  ;;  %v218_v57 = vld [vmem:[#allocation11 + $0x60] sm:$0xff]  ;;  %v219_v58 = vld [vmem:[#allocation11 + $0x68] sm:$0xff]  ;;  %v1962_v59 = vpack.c.bf16 %v117_v53, %v115_v52 }
  0x68   :  { %1953 = vmatprep.subr.bf16.mxu0 %v1952_v32  ;;  %1985 = vmatprep.subr.bf16.mxu1 %v1984_v35  ;;  %v1964_v60 = vpack.c.bf16 %v122_v56, %v120_v55  ;;  %v119_v61 = vld [vmem:[#allocation9 + $0xc0] sm:$0xff]  ;;  %v121_v62 = vld [vmem:[#allocation9 + $0xd0] sm:$0xff]  ;;  %v1996_v63 = vpack.c.bf16 %v219_v58, %v218_v57  ;;  %v124_v1 = vld [vmem:[#allocation9 + $0xe8] sm:$0xff] }
  0x69   :  { %v126_v2 = vld [vmem:[#allocation9 + $0xf8] sm:$0xff]  ;;  %v220_v3 = vld [vmem:[#allocation11 + $0x70] sm:$0xff]  ;;  %v1966_v5 = vpack.c.bf16 %v121_v62, %v119_v61  ;;  %v123_v7 = vld [vmem:[#allocation9 + $0xe0] sm:$0xff] }
  0x6a   :  { %v221_v4 = vld [vmem:[#allocation11 + $0x78] sm:$0xff]  ;;  %v1968_v6 = vpack.c.bf16 %v126_v2, %v124_v1  ;;  %v125_v8 = vld [vmem:[#allocation9 + $0xf0] sm:$0xff]  ;;  %v199_v12 = vld [vmem:[#allocation6 + $0x8] sm:$0xff] }
  0x6b   :  { %1955 = vmatpush1.bf16.msra.mxu0 %v1954_v40  ;;  %1987 = vmatpush3.bf16.msra.mxu1 %v1984_v35  ;;  %v2000_v9 = vpack.c.bf16 %v221_v4, %v220_v3  ;;  %v1970_v10 = vpack.c.bf16 %v125_v8, %v123_v7  ;;  %v2313_v11 = vld [vmem:[#allocation3] sm:$0xff]  ;;  %v200_v13 = vld [vmem:[#allocation6 + $0x10] sm:$0xff]  ;;  %v202_v15 = vld [vmem:[#allocation6 + $0x20] sm:$0xff] }
  0x6c   :  { %1957 = vmatprep.subr.bf16.mxu0 %v1956_v41  ;;  %1989 = vmatprep.subr.bf16.mxu1 %v1988_v44  ;;  %v201_v14 = vld [vmem:[#allocation6 + $0x18] sm:$0xff]  ;;  %v203_v16 = vld [vmem:[#allocation6 + $0x28] sm:$0xff]  ;;  %v204_v17 = vld [vmem:[#allocation6 + $0x30] sm:$0xff] }
  0x6d   :  { %v205_v18 = vld [vmem:[#allocation6 + $0x38] sm:$0xff] }
  0x6f   :  { %1959 = vmatpush1.bf16.msra.mxu0 %v1958_v49  ;;  %1991 = vmatpush3.bf16.msra.mxu1 %v1988_v44 }
  0x70   :  { %1961 = vmatprep.subr.bf16.mxu0 %v1960_v51  ;;  %1993 = vmatprep.subr.bf16.mxu1 %v1992_v54 }
  0x73   :  { %1963 = vmatpush1.bf16.msra.mxu0 %v1962_v59  ;;  %1995 = vmatpush3.bf16.msra.mxu1 %v1992_v54 }
  0x74   :  { %1965 = vmatprep.subr.bf16.mxu0 %v1964_v60  ;;  %1997 = vmatprep.subr.bf16.mxu1 %v1996_v63 }
  0x77   :  { %1967 = vmatpush1.bf16.msra.mxu0 %v1966_v5  ;;  %1999 = vmatpush3.bf16.msra.mxu1 %v1996_v63 }
  0x78   :  { %1969 = vmatprep.subr.bf16.mxu0 %v1968_v6  ;;  %2001 = vmatprep.subr.bf16.mxu1 %v2000_v9 }
  0x7b   :  { %1971 = vmatpush1.bf16.msra.mxu0 %v1970_v10  ;;  %2003 = vmatpush3.bf16.msra.mxu1 %v2000_v9 }
  0x7c   :  { %1860 = vmatprep.subr.mxu0 %v2192_v0  ;;  %1880 = vmatprep.subr.mxu1 %v2192_v0 }
  0x7e   :  { %192 = vmatmul.mubr.f32.vlgmr.msra.gmra.mrb[0].mxu0 %v2313_v11  ;;  %1849 = vmatmul.mubr.f32.vlgmr.msra.gmra.mrb[0].mxu1 %v199_v12 }
  0x7f   :  { %1851 = vmatprep.mubr.f32.mxu1 %v200_v13  ;;  %1862 = vmatprep.mubr.msk.f32.mxu0 %vm2193_vm0, %v2192_v0 }
  0x82   :  { %1852 = vmatmul.mubr.f32.gmra.mrb[2].mxu1 %v201_v14 }
  0x83   :  { %1854 = vmatprep.mubr.f32.mxu1 %v202_v15 }
  0x86   :  { %1855 = vmatmul.mubr.f32.gmra.mrb[4].mxu1 %v203_v16 }
  0x87   :  { %1857 = vmatprep.mubr.f32.mxu1 %v204_v17 }
  0x8a   :  { %1858 = vmatmul.mubr.f32.gmra.mrb[6].mxu1 %v205_v18 }
  0x8b   :  { %1882 = vmatprep.mubr.msk.f32.mxu1 %vm2193_vm0, %v2192_v0 }
 0x151   :  { %v193_v25 = vpop.f32.mrb[0].mxu0  ;;  %v1850_v27 = vpop.f32.mrb[0].mxu1 }
 0x152   :  { %v339_v26 = vrot.slane %v193_v25, %v338_v24  ;;  %v195_v28 = vpop.f32.mrb[1].mxu0  ;;  %v288_v29 = vpop.f32.mrb[1].mxu1  ;;  %v332_v32 = vcombine.high %v193_v25, %v193_v25 }
 0x153   :  { %v327_v30 = vmul.f32 %v195_v28, %v193_v25  ;;  %1861 = vmatpush3.xpose.msra.mxu0 %v288_v29 }
 0x154   :  { %v355_v31 = vrot.slane %v339_v26, %v338_v24  ;;  %v347_v33 = vcombine.high %v339_v26, %v339_v26  ;;  %1865 = vmatprep.subr.mxu0 %v2192_v0  ;;  %v346_v36 = vrot.slane %v332_v32, %v338_v24 }
 0x155   :  { %328 = vadd.xlane.f32.xlu0 %v327_v30  ;;  %v1853_v34 = vpop.f32.mrb[2].mxu1 }
 0x156   :  { %v298_v35 = vpop.f32.mrb[3].mxu1  ;;  %1863 = vmatmul.mubr.f32.vlgmr.msra.gmra.mrb[2].mxu0 %v355_v31  ;;  %v369_v37 = vrot.slane %v347_v33, %v338_v24  ;;  %v362_v40 = vrot.slane %v346_v36, %v338_v24  ;;  %v377_v41 = vcombine.high %v355_v31, %v355_v31  ;;  %v348_v44 = vcombine.high %v346_v36, %v346_v36 }
 0x157   :  { %1866 = vmatpush3.xpose.msra.mxu0 %v1850_v27  ;;  %1867 = vmatprep.mubr.msk.f32.mxu0 %vm2193_vm0, %v2192_v0 }
 0x158   :  { %1870 = vmatprep.subr.mxu0 %v2192_v0  ;;  %v379_v45 = vcombine.high %v369_v37, %v369_v37  ;;  %v378_v46 = vcombine.high %v362_v40, %v362_v40  ;;  %v376_v47 = vrot.slane %v348_v44, %v338_v24 }
 0x159   :  { %v1856_v38 = vpop.f32.mrb[4].mxu1 }
 0x15a   :  { %v308_v39 = vpop.f32.mrb[5].mxu1  ;;  %1868 = vmatmul.mubr.f32.vlgmr.msra.gmra.mrb[4].mxu0 %v369_v37  ;;  %v380_v48 = vcombine.high %v376_v47, %v376_v47 }
 0x15b   :  { %1871 = vmatpush3.xpose.msra.mxu0 %v298_v35  ;;  %1881 = vmatpush3.xpose.msra.mxu1 %v308_v39 }
 0x15c   :  { %1872 = vmatprep.mubr.msk.f32.mxu0 %vm2193_vm0, %v2192_v0  ;;  %1875 = vmatprep.subr.mxu0 %v2192_v0 }
 0x15d   :  { %v1859_v42 = vpop.f32.mrb[6].mxu1  ;;  %1890 = vmatprep.subr.mxu1 %v2192_v0 }
 0x15e   :  { %v318_v43 = vpop.f32.mrb[7].mxu1  ;;  %1873 = vmatmul.mubr.f32.vlgmr.msra.gmra.mrb[6].mxu0 %v377_v41  ;;  %1883 = vmatmul.mubr.f32.vlgmr.msra.gmra.mrb[8].mxu1 %v362_v40 }
 0x15f   :  { %1876 = vmatpush3.xpose.msra.mxu0 %v1853_v34  ;;  %1891 = vmatpush3.xpose.msra.mxu1 %v318_v43 }
 0x160   :  { %1877 = vmatprep.mubr.msk.f32.mxu0 %vm2193_vm0, %v2192_v0  ;;  %1892 = vmatprep.mubr.msk.f32.mxu1 %vm2193_vm0, %v2192_v0 }
 0x161   :  { %1885 = vmatprep.subr.mxu0 %v2192_v0  ;;  %1900 = vmatprep.subr.mxu1 %v2192_v0 }
 0x162   :  { %1878 = vmatmul.mubr.f32.vlgmr.msra.gmra.mrb[8].mxu0 %v379_v45  ;;  %1893 = vmatmul.mubr.f32.vlgmr.msra.gmra.mrb[10].mxu1 %v378_v46 }
 0x163   :  { %1886 = vmatpush3.xpose.msra.mxu0 %v1856_v38  ;;  %1887 = vmatprep.mubr.msk.f32.mxu0 %vm2193_vm0, %v2192_v0 }
 0x164   :  { %1895 = vmatprep.subr.mxu0 %v2192_v0  ;;  %1902 = vmatprep.mubr.msk.f32.mxu1 %vm2193_vm0, %v2192_v0 }
 0x166   :  { %1888 = vmatmul.mubr.f32.vlgmr.msra.gmra.mrb[10].mxu0 %v376_v47 }
 0x167   :  { %1896 = vmatpush3.xpose.msra.mxu0 %v1859_v42  ;;  %1897 = vmatprep.mubr.msk.f32.mxu0 %vm2193_vm0, %v2192_v0 }
 0x168   :  { %1905 = vmatprep.subr.mxu0 %v2192_v0 }
 0x16a   :  { %1898 = vmatmul.mubr.f32.vlgmr.msra.gmra.mrb[12].mxu0 %v380_v48 }
 0x16b   :  { %1907 = vmatprep.mubr.msk.f32.mxu0 %vm2193_vm0, %v2192_v0 }
 0x1e2   :  { %v329_v26 = vpop.xlane.xlu0 %328 }
 0x1e3   :  { %v2354_v27 = vmul.f32 0.088388346, %v329_v26  ;;  %v1090_v26 = vld [vmem:[#allocation8 + $0x10] sm:$0xff] }
 0x229   :  { %v455_v49 = vpop.f32.mrb[2].mxu0 }
 0x22a   :  { %v1864_v50 = vpop.f32.mrb[3].mxu0  ;;  %v949_v63 = vmul.f32 0.088388346, %v455_v49 }
 0x22d   :  { %v525_v51 = vpop.f32.mrb[4].mxu0 }
 0x22e   :  { %v1869_v52 = vpop.f32.mrb[5].mxu0  ;;  %v950_v53 = vmul.f32 0.088388346, %v525_v51 }
 0x230   :  { %v965_v59 = vrot.slane %v950_v53, 7 }
 0x231   :  { %v595_v54 = vpop.f32.mrb[6].mxu0  ;;  %v735_v55 = vpop.f32.mrb[8].mxu1 }
 0x232   :  { %v951_v56 = vmul.f32 0.088388346, %v595_v54  ;;  %v1874_v57 = vpop.f32.mrb[7].mxu0  ;;  %v1884_v58 = vpop.f32.mrb[9].mxu1  ;;  %v953_v4 = vmul.f32 0.088388346, %v735_v55  ;;  %v967_v5 = vsel %vm966_vm1, %v965_v59, %v949_v63 }
 0x234   :  { %v968_v60 = vrot.slane %v951_v56, 6  ;;  %v974_v13 = vrot.slane %v953_v4, 4 }
 0x235   :  { %v665_v61 = vpop.f32.mrb[8].mxu0  ;;  %v875_v62 = vpop.f32.mrb[10].mxu1 }
 0x236   :  { %v952_v1 = vmul.f32 0.088388346, %v665_v61  ;;  %v1879_v2 = vpop.f32.mrb[9].mxu0  ;;  %v1894_v3 = vpop.f32.mrb[11].mxu1  ;;  %v970_v7 = vsel %vm969_vm2, %v968_v60, %v967_v5  ;;  %v955_v14 = vmul.f32 0.088388346, %v875_v62 }
 0x238   :  { %v971_v6 = vrot.slane %v952_v1, 5  ;;  %v980_v21 = vrot.slane %v955_v14, 2 }
 0x239   :  { %v805_v8 = vpop.f32.mrb[10].mxu0 }
 0x23a   :  { %v973_v9 = vsel %vm972_vm3, %v971_v6, %v970_v7  ;;  %v954_v10 = vmul.f32 0.088388346, %v805_v8  ;;  %v1889_v12 = vpop.f32.mrb[11].mxu0 }
 0x23b   :  { %v976_v17 = vsel %vm975_vm4, %v974_v13, %v973_v9 }
 0x23c   :  { %v977_v15 = vrot.slane %v954_v10, 3 }
 0x23d   :  { %v945_v16 = vpop.f32.mrb[12].mxu0 }
 0x23e   :  { %v956_v18 = vmul.f32 0.088388346, %v945_v16  ;;  %v1899_v19 = vpop.f32.mrb[13].mxu0  ;;  %v979_v20 = vsel %vm978_vm5, %v977_v15, %v976_v17  ;;  %v1088_v15 = vld [vmem:[#allocation8] sm:$0xff]  ;;  %v1089_v16 = vld [vmem:[#allocation8 + $0x8] sm:$0xff] }
 0x23f   :  { %v982_v23 = vsel %vm981_vm6, %v980_v21, %v979_v20  ;;  %1901 = vmatpush3.msra.mxu1 %v1088_v15  ;;  %1906 = vmatpush3.msra.mxu0 %v1089_v16  ;;  %v1758_v17 = vld [vmem:[%s2451_s5] ss:$0 sm:$0xff] }
 0x240   :  { %v983_v22 = vrot.slane %v956_v18, 1  ;;  %1910 = vmatprep.subr.mxu1 %v2192_v0  ;;  %1915 = vmatprep.subr.mxu0 %v2192_v0 }
 0x242   :  { %v985_v24 = vsel %vm984_vm7, %v983_v22, %v982_v23 }
 0x243   :  { %v988_v25 = vsel %vm987_vm8, %v985_v24, -inf }
 0x244   :  { %989 = vmax.xlane.f32.xlu0 %v988_v25 }
 0x2d1   :  { %v990_v28 = vpop.xlane.xlu0 %989 }
 0x2d2   :  { %v2357_v29 = vmax.f32 %v2354_v27, %v990_v28 }
 0x2d4   :  { %v996_v30 = vrot.slane %v2357_v29, 1  ;;  %v997_v31 = vrot.slane %v2357_v29, 2  ;;  %v998_v32 = vrot.slane %v2357_v29, 3  ;;  %v999_v33 = vrot.slane %v2357_v29, 4 }
 0x2d5   :  { %v1000_v34 = vrot.slane %v2357_v29, 5  ;;  %v1001_v35 = vrot.slane %v2357_v29, 6  ;;  %v1002_v36 = vrot.slane %v2357_v29, 7  ;;  %v1011_v37 = vsub.f32 %v949_v63, %v2357_v29 }
 0x2d6   :  { %v1012_v38 = vsub.f32 %v950_v53, %v996_v30  ;;  %v1013_v39 = vsub.f32 %v951_v56, %v997_v31  ;;  %v1014_v40 = vsub.f32 %v952_v1, %v998_v32  ;;  %v1015_v41 = vsub.f32 %v953_v4, %v999_v33  ;;  %v1092_v33 = vld [vmem:[#allocation8 + $0x20] sm:$0xff] }
 0x2d7   :  { %v1016_v42 = vsub.f32 %v954_v10, %v1000_v34  ;;  %v1017_v43 = vsub.f32 %v955_v14, %v1001_v35  ;;  %v1018_v44 = vsub.f32 %v956_v18, %v1002_v36  ;;  %v1019_v45 = vmul.f32 1.442695, %v1011_v37  ;;  %v1093_v36 = vld [vmem:[#allocation8 + $0x28] sm:$0xff] }
 0x2d8   :  { %v1021_v46 = vmul.f32 1.442695, %v1012_v38  ;;  %v1023_v47 = vmul.f32 1.442695, %v1013_v39  ;;  %v1025_v48 = vmul.f32 1.442695, %v1014_v40  ;;  %v992_v49 = vsub.f32 %v2354_v27, %v2357_v29 }
 0x2d9   :  { %2017 = vpow2.f32 %v1019_v45  ;;  %v1027_v50 = vmul.f32 1.442695, %v1015_v41  ;;  %v1029_v51 = vmul.f32 1.442695, %v1016_v42  ;;  %v1031_v52 = vmul.f32 1.442695, %v1017_v43 }
 0x2da   :  { %2019 = vpow2.f32 %v1021_v46  ;;  %v1033_v53 = vmul.f32 1.442695, %v1018_v44  ;;  %v1712_v18 = vmul.f32 %v1758_v17, %v2313_v11  ;;  %v993_v19 = vmul.f32 1.442695, %v992_v49  ;;  %v1091_v29 = vld [vmem:[#allocation8 + $0x18] sm:$0xff]  ;;  %v1094_v39 = vld [vmem:[#allocation8 + $0x30] sm:$0xff] }
 0x2db   :  { %2021 = vpow2.f32 %v1023_v47  ;;  %v1095_v42 = vld [vmem:[#allocation8 + $0x38] sm:$0xff]  ;;  %v1716_v46 = vstv %s2452_s6  ;;  %s2195_s6 = smov [#allocation12]  }
 0x2dc   :  { %2023 = vpow2.f32 %v1025_v48  ;;  %s1739_s3 = sshll.u32 %s2195_s6, 4  ;;  %s1740_s3 = int_to_ptr.vmem [resolvable:$true] %s1739_s3 }
 0x2dd   :  { %2025 = vpow2.f32 %v1027_v50  ;;  %s2153_s16 = scalar_lea.vmem %s1740_s3, 128  ;;  %p2158_p13 = scmp.lt.s32.totalorder %s1740_s3, %s1740_s3 }
 0x2de   :  { %2027 = vpow2.f32 %v1029_v51  ;;  %p2154_p12 = scmp.ne.s32.totalorder %s1740_s3, %s2153_s16  ;;  %p2159_p0 = scmp.lt.s32.totalorder %s2153_s16, %s2153_s16 }
 0x2df   :  { %2029 = vpow2.f32 %v1031_v52 }
 0x2e0   :  { %2031 = vpow2.f32 %v1033_v53  ;;  %p2160_p1 = por %p2159_p0, %p2158_p13 }
 0x2e1   :  { %2033 = vpow2.f32 %v993_v19 }
 0x2e2   :  { %p2161_p2 = pnand %p2160_p1, %p2154_p12 }
 0x2e3   :  { %v2018_v54 = vpop.eup %2017 }
 0x2e4   :  { %v2020_v55 = vpop.eup %2019 }
 0x2e5   :  { %v2022_v56 = vpop.eup %2021  ;;  %v1043_v57 = vrot.slane %v2020_v55, 7 }
 0x2e6   :  { %v2024_v58 = vpop.eup %2023  ;;  %v1045_v59 = vrot.slane %v2022_v56, 6 }
 0x2e7   :  { %v2026_v60 = vpop.eup %2025  ;;  %v1044_v61 = vsel %vm966_vm1, %v1043_v57, %v2018_v54  ;;  %v1047_v62 = vrot.slane %v2024_v58, 5 }
 0x2e8   :  { %v2370_v63 = vpop.eup %2027  ;;  %v1046_v1 = vsel %vm969_vm2, %v1045_v59, %v1044_v61  ;;  %v1049_v2 = vrot.slane %v2026_v60, 4 }
 0x2e9   :  { %v2373_v3 = vpop.eup %2029  ;;  %v1048_v4 = vsel %vm972_vm3, %v1047_v62, %v1046_v1  ;;  %v1051_v5 = vrot.slane %v2370_v63, 3 }
 0x2ea   :  { %v2377_v6 = vpop.eup %2031  ;;  %v1050_v7 = vsel %vm975_vm4, %v1049_v2, %v1048_v4  ;;  %v1053_v8 = vrot.slane %v2373_v3, 2 }
 0x2eb   :  { %v1052_v9 = vsel %vm978_vm5, %v1051_v5, %v1050_v7  ;;  %v1055_v10 = vrot.slane %v2377_v6, 1  ;;  %v2034_v20 = vpop.eup %2033 }
 0x2ec   :  { %v1054_v12 = vsel %vm981_vm6, %v1053_v8, %v1052_v9 }
 0x2ed   :  { %v1056_v13 = vsel %vm984_vm7, %v1055_v10, %v1054_v12 }
 0x2ee   :  { %v1058_v14 = vsel %vm987_vm8, %v1056_v13, 0.0 }
 0x2ef   :  { %1059 = vadd.xlane.f32.xlu1 %v1058_v14 }
 0x2f3   :  { %1713 = vadd.xlane.f32.xlu1 %v1712_v18 }
 0x37c   :  { %v1060_v21 = vpop.xlane.xlu1 %1059 }
 0x37d   :  { %v1061_v22 = vadd.f32 %v2034_v20, %v1060_v21 }
 0x37f   :  { %2035 = vrcp.f32 %v1061_v22 }
 0x380   :  { %v1714_v47 = vpop.xlane.xlu1 %1713 }
 0x381   :  { %v1717_v48 = vadd.f32 %v1716_v46, %v1714_v47 }
 0x383   :  { %v1759_v49 = vmul.f32 -1.442695, %v1717_v48 }
 0x385   :  { %2037 = vpow2.f32 %v1759_v49 }
 0x389   :  { %v2036_v23 = vpop.eup %2035 }
 0x38a   :  { %v1080_v24 = vmul.f32 %v2036_v23, %v2018_v54  ;;  %v1065_v25 = vrot.slane %v2036_v23, 1  ;;  %v1066_v27 = vrot.slane %v2036_v23, 2  ;;  %v1067_v30 = vrot.slane %v2036_v23, 3 }
 0x38b   :  { %v2393_v31 = vmul.f32 %v2036_v23, %v2034_v20  ;;  %v1068_v34 = vrot.slane %v2036_v23, 4  ;;  %v1069_v37 = vrot.slane %v2036_v23, 5  ;;  %v1070_v40 = vrot.slane %v2036_v23, 6 }
 0x38c   :  { %1903 = vmatmul.mubr.msk.f32.vlgmr.msra.gmra.mrb[12].mxu1 %vm987_vm8, %v1080_v24  ;;  %v1081_v28 = vmul.f32 %v2020_v55, %v1065_v25  ;;  %v1082_v32 = vmul.f32 %v2022_v56, %v1066_v27  ;;  %v1083_v35 = vmul.f32 %v2024_v58, %v1067_v30  ;;  %v1071_v43 = vrot.slane %v2036_v23, 7 }
 0x38d   :  { %1911 = vmatpush3.msra.mxu1 %v1090_v26  ;;  %1912 = vmatprep.mubr.msk.f32.mxu1 %vm2193_vm0, %v2192_v0  ;;  %v1084_v38 = vmul.f32 %v2026_v60, %v1068_v34  ;;  %v1085_v41 = vmul.f32 %v2370_v63, %v1069_v37  ;;  %v1086_v44 = vmul.f32 %v2373_v3, %v1070_v40 }
 0x38e   :  { %1908 = vmatmul.mubr.msk.f32.vlgmr.msra.gmra.mrb[14].mxu0 %vm987_vm8, %v1081_v28  ;;  %1920 = vmatprep.subr.mxu1 %v2192_v0  ;;  %v1087_v45 = vmul.f32 %v2377_v6, %v1071_v43  ;;  %v1680_v18 = vmul.f32 %v2393_v31, %v2313_v11 }
 0x38f   :  { %1916 = vmatpush3.msra.mxu0 %v1091_v29  ;;  %1917 = vmatprep.mubr.msk.f32.mxu0 %vm2193_vm0, %v2192_v0  ;;  %v2038_v50 = vpop.eup %2037 }
 0x390   :  { %1913 = vmatmul.mubr.msk.f32.vlgmr.msra.gmra.mrb[14].mxu1 %vm987_vm8, %v1082_v32  ;;  %1925 = vmatprep.subr.mxu0 %v2192_v0  ;;  %v1721_v54 = vadd.f32 1.0, %v2038_v50 }
 0x391   :  { %1921 = vmatpush3.msra.mxu1 %v1092_v33  ;;  %1922 = vmatprep.mubr.msk.f32.mxu1 %vm2193_vm0, %v2192_v0 }
 0x392   :  { %1918 = vmatmul.mubr.msk.f32.vlgmr.msra.gmra.mrb[16].mxu0 %vm987_vm8, %v1083_v35  ;;  %1930 = vmatprep.subr.mxu1 %v2192_v0  ;;  %2039 = vrcp.f32 %v1721_v54 }
 0x393   :  { %1926 = vmatpush3.msra.mxu0 %v1093_v36  ;;  %1927 = vmatprep.mubr.msk.f32.mxu0 %vm2193_vm0, %v2192_v0 }
 0x394   :  { %1923 = vmatmul.mubr.msk.f32.vlgmr.msra.gmra.mrb[16].mxu1 %vm987_vm8, %v1084_v38  ;;  %1935 = vmatprep.subr.mxu0 %v2192_v0 }
 0x395   :  { %1931 = vmatpush3.msra.mxu1 %v1094_v39  ;;  %1932 = vmatprep.mubr.msk.f32.mxu1 %vm2193_vm0, %v2192_v0 }
 0x396   :  { %1928 = vmatmul.mubr.msk.f32.vlgmr.msra.gmra.mrb[18].mxu0 %vm987_vm8, %v1085_v41 }
 0x397   :  { %1936 = vmatpush3.msra.mxu0 %v1095_v42  ;;  %1937 = vmatprep.mubr.msk.f32.mxu0 %vm2193_vm0, %v2192_v0 }
 0x398   :  { %1933 = vmatmul.mubr.msk.f32.vlgmr.msra.gmra.mrb[18].mxu1 %vm987_vm8, %v1086_v44 }
 0x39a   :  { %1938 = vmatmul.mubr.msk.f32.vlgmr.msra.gmra.mrb[20].mxu0 %vm987_vm8, %v1087_v45 }
 0x39c   :  { %v2040_v19 = vpop.eup %2039 }
 0x45f   :  { %v1165_v51 = vpop.f32.mrb[12].mxu1 }
 0x460   :  { %v1904_v52 = vpop.f32.mrb[13].mxu1 }
 0x461   :  { %v1238_v53 = vpop.f32.mrb[14].mxu0 }
 0x462   :  { %v1689_v0 = vrot.slane %v1238_v53, 7  ;;  %v1909_v55 = vpop.f32.mrb[15].mxu0 }
 0x463   :  { %v1311_v56 = vpop.f32.mrb[14].mxu1 }
 0x464   :  { %v1690_v57 = vsel %vm966_vm1, %v1689_v0, %v1165_v51  ;;  %v1691_v58 = vrot.slane %v1311_v56, 6  ;;  %v1914_v59 = vpop.f32.mrb[15].mxu1 }
 0x465   :  { %v1384_v60 = vpop.f32.mrb[16].mxu0 }
 0x466   :  { %v1692_v61 = vsel %vm969_vm2, %v1691_v58, %v1690_v57  ;;  %v1693_v62 = vrot.slane %v1384_v60, 5  ;;  %v1919_v63 = vpop.f32.mrb[17].mxu0 }
 0x467   :  { %v1457_v1 = vpop.f32.mrb[16].mxu1 }
 0x468   :  { %v1694_v2 = vsel %vm972_vm3, %v1693_v62, %v1692_v61  ;;  %v1695_v3 = vrot.slane %v1457_v1, 4  ;;  %v1924_v4 = vpop.f32.mrb[17].mxu1 }
 0x469   :  { %v1530_v5 = vpop.f32.mrb[18].mxu0 }
 0x46a   :  { %v1696_v6 = vsel %vm975_vm4, %v1695_v3, %v1694_v2  ;;  %v1697_v7 = vrot.slane %v1530_v5, 3  ;;  %v1929_v8 = vpop.f32.mrb[19].mxu0 }
 0x46b   :  { %v1603_v9 = vpop.f32.mrb[18].mxu1 }
 0x46c   :  { %v1698_v10 = vsel %vm978_vm5, %v1697_v7, %v1696_v6  ;;  %v1699_v12 = vrot.slane %v1603_v9, 2  ;;  %v1934_v13 = vpop.f32.mrb[19].mxu1 }
 0x46d   :  { %v1676_v14 = vpop.f32.mrb[20].mxu0 }
 0x46e   :  { %v1700_v15 = vsel %vm981_vm6, %v1699_v12, %v1698_v10  ;;  %v1701_v16 = vrot.slane %v1676_v14, 1  ;;  %v1939_v17 = vpop.f32.mrb[21].mxu0 }
 0x470   :  { %v1702_v20 = vsel %vm984_vm7, %v1701_v16, %v1700_v15 }
 0x471   :  { %v1704_v21 = vadd.f32 %v1702_v20, %v1680_v18 }
 0x473   :  { %v1724_v22 = vmul.f32 %v2040_v19, %v1704_v21 }
 0x475   :  { %v1725_v23 = vadd.f32 %v1724_v22, %v2313_v11 }
 0x477   :  { %v1726_v24 = vmul.f32 %v1725_v23, %v1725_v23 }
 0x479   :  { %1727 = vadd.xlane.f32.xlu0 %v1726_v24 }
 0x506   :  { %v1728_v25 = vpop.xlane.xlu0 %1727 }
 0x507   :  { %v1729_v26 = vmax.f32 %v1728_v25, 1e-24 }
 0x509   :  { %2041 = vrsqrt.f32 %v1729_v26 }
 0x513   :  { %v2042_v27 = vpop.eup %2041 }
 0x514   :  { %v1731_v28 = vmul.f32 %v2042_v27, %v1725_v23 }
 0x516   :  { %1732 = vst [vmem:[#allocation12] sm:$0xff] %v1731_v28 }
 0x517   :  { %2164 = shalt.err (!%p2161_p2)
}
 0x518   :  { %s2165_s21 = scalar_lea.hbm %s2453_s7, 128 }
 0x519   :  { %p2166_p3 = scmp.ne.s32.totalorder %s2453_s7, %s2165_s21  ;;  %p2169_p4 = scmp.lt.u32.totalorder %s2165_s21, %s2453_s7 }
 0x51b   :  { %p2171_p5 = pnand %p2169_p4, %p2166_p3 }
 0x51d   :  { %2174 = shalt.err (!%p2171_p5)
}
 0x51e   :  { %1742 = dma.vmem_to_hbm [thread:$0]  %s1740_s3, 128, %s2453_s7, [#allocation5]  }
 0x51f   :  { %2181 = dma.done.wait [#allocation5], 128  }
 0x520   :  { %2182 = vsyncadd [#allocation5], 4294967168 }
 0x521   :  { %1746 = vsyncpa [#allocation4], 1 }
 0x522   :  { %1747 = vsyncpa [#allocation7], 1 }
 0x523   :  { %1748 = vsyncpa [#allocation10], 1 }
 0x524   :  { %1749 = vsyncpa [#allocation5], 1 }

</bundles_post_ra>
